<compile_context>
chip_gen: v7x
topology: tpu7x:2x2x1
jax: 0.10.0
libtpu: 0.0.40
codegen_flags: <defaults>
</compile_context>

<pallas_src>
import jax
import jax.numpy as jnp
from jax import lax
from jax.experimental import pallas as pl
from jax.experimental.pallas import tpu as pltpu


# ---------------------------------------------------------------------------
# Kernels
# ---------------------------------------------------------------------------

def _logits_block(zr, zc, nj, alpha):
    # MXU: Gram block Z_rows . Z_cols^T, contracted on axis 1 of both operands
    # (no explicit transpose / XLU work).
    g = lax.dot_general(
        zr, zc,
        dimension_numbers=(((1,), (1,)), ((), ())),
        preferred_element_type=jnp.float32,
    )                                                    # (tile_n, tile_c)
    ni = jnp.sum(zr * zr, axis=1, keepdims=True)         # (tile_n, 1)
    # -(||zi||^2 - 2 zi.zj + ||zj||^2) + alpha
    return 2.0 * g - ni - nj + alpha


def _decoder_kernel_edges(alpha_ref, nsq_ref, zr_ref, zc_ref, yb_ref, out_ref):
    # alpha_ref: (1, 1)          SMEM scalar
    # nsq_ref  : (1, tile_c)     hoisted column squared norms
    # zr_ref   : (tile_n, D)     row tile of Z
    # zc_ref   : (tile_c, D)     column tile of Z
    # yb_ref   : (tile_n, tile_c) precomputed (Y @ beta) plane (f32 or bf16)
    # out_ref  : (tile_n, tile_c)
    logits = _logits_block(zr_ref[...], zc_ref[...], nsq_ref[...], alpha_ref[0, 0])
    logits = logits + yb_ref[...].astype(jnp.float32)    # accumulate in place
    out_ref[...] = jax.nn.sigmoid(logits).astype(out_ref.dtype)


def _decoder_kernel_noedges(alpha_ref, nsq_ref, zr_ref, zc_ref, out_ref):
    logits = _logits_block(zr_ref[...], zc_ref[...], nsq_ref[...], alpha_ref[0, 0])
    out_ref[...] = jax.nn.sigmoid(logits).astype(out_ref.dtype)


# ---------------------------------------------------------------------------
# Tiling helpers (VMEM-budget aware)
# ---------------------------------------------------------------------------

def _round_up(x, m):
    return ((x + m - 1) // m) * m


def _vmem_capacity_bytes():
    """Physical VMEM per TensorCore, with a conservative fallback (v7x: 64 MiB)."""
    try:
        info = pltpu.get_tpu_info()
        for attr in ("vmem_capacity_bytes", "vmem_size_bytes", "vmem_bytes"):
            cap = getattr(info, attr, None)
            if cap:
                return int(cap)
    except Exception:
        pass
    return 64 * 1024 * 1024


def _largest_aligned_divisor(n, align, cap):
    """Largest multiple of `align` dividing n and <= cap (assumes n % align == 0)."""
    cap = max(align, min(cap, n))
    t = (cap // align) * align
    while t > align:
        if n % t == 0:
            return t
        t -= align
    return align


def _block_bytes(tn, tc, d, yb_itemsize, out_itemsize):
    """Double-buffered per-block VMEM footprint estimate."""
    d_lane = _round_up(max(d, 1), 128)
    return (2 * tn * tc * yb_itemsize          # Y.beta tile
            + 2 * tn * tc * out_itemsize       # output tile
            + 2 * tn * d_lane * 4              # Z row tile (lane-padded)
            + 2 * tc * d_lane * 4              # Z col tile (lane-padded)
            + 2 * 8 * tc * 4)                  # col-norm row (sublane-padded)


def _select_tiles(n_pad, d, yb_itemsize, out_itemsize, vmem_cap):
    """Big tiles on 128 MiB parts (v5e/v6e); tighter computed budget on 64 MiB v7x."""
    budget = min(int(0.40 * vmem_cap), 48 * 1024 * 1024)
    tn = _largest_aligned_divisor(n_pad, 8, 512)
    tc = _largest_aligned_divisor(n_pad, 128, 2048)
    while _block_bytes(tn, tc, d, yb_itemsize, out_itemsize) > budget:
        if tc > 128 and tc >= 2 * tn:
            tc = _largest_aligned_divisor(n_pad, 128, tc // 2)
        elif tn > 8:
            tn = _largest_aligned_divisor(n_pad, 8, tn // 2)
        elif tc > 128:
            tc = _largest_aligned_divisor(n_pad, 128, tc // 2)
        else:
            break
    return tn, tc


# ---------------------------------------------------------------------------
# Wrapper
# ---------------------------------------------------------------------------

def decoder_forward(Z, Y=None, alpha=0.0, beta=None, *, yb=None, use_edges=True,
                    yb_dtype=jnp.bfloat16, out_dtype=jnp.float32,
                    tile_n=None, tile_c=None):
    """Pallas implementation of Decoder.forward.

    Z: (N, D) latent positions; Y: (N, N, P) edge covariates; beta: (P,);
    alpha: scalar.  Optionally pass a precomputed / cached `yb = Y @ beta`
    (N, N) plane to skip the covariate contraction entirely.
    Returns A_pred: (N, N) in `out_dtype`.
    """
    N, D = Z.shape
    Z = Z.astype(jnp.float32)
    alpha_arr = jnp.asarray(alpha, jnp.float32).reshape(1, 1)

    if use_edges:
        if yb is None:
            assert Y is not None and beta is not None, "use_edges=True needs Y/beta or yb"
            P = beta.shape[0]
            assert Y.shape == (N, N, P)
            # One XLA pass over Y (N*N*P read + N*N write) replaces the old
            # (P,N,N) transpose + per-plane kernel streaming.
            yb = jnp.einsum("nmp,p->nm", Y, beta,
                            preferred_element_type=jnp.float32)
        assert yb.shape == (N, N)
        yb = yb.astype(yb_dtype)

    # Pad N up to a multiple of 128 so every block is (8,128)-aligned and the
    # pipeline stays bounded-VMEM for arbitrary N (no tile=N fallback).
    n_pad = max(_round_up(N, 128), 128)
    if n_pad != N:
        Zp = jnp.pad(Z, ((0, n_pad - N), (0, 0)))
        if use_edges:
            yb = jnp.pad(yb, ((0, n_pad - N), (0, n_pad - N)))
    else:
        Zp = Z

    # Hoisted column squared norms (reused across all row tiles).
    nsq = jnp.sum(Zp * Zp, axis=1).reshape(1, n_pad)

    vmem_cap = _vmem_capacity_bytes()
    yb_itemsize = jnp.dtype(yb_dtype).itemsize if use_edges else 0
    out_itemsize = jnp.dtype(out_dtype).itemsize
    auto_tn, auto_tc = _select_tiles(n_pad, D, yb_itemsize, out_itemsize, vmem_cap)
    tn = int(tile_n) if tile_n is not None else auto_tn
    tc = int(tile_c) if tile_c is not None else auto_tc
    assert n_pad % tn == 0 and n_pad % tc == 0, "tiles must divide padded N"
    assert tn % 8 == 0 and tc % 128 == 0, "tiles must be (8,128)-aligned"

    need = _block_bytes(tn, tc, D, yb_itemsize, out_itemsize)
    vmem_limit = int(min(max(2 * need, 24 * 1024 * 1024), int(0.85 * vmem_cap)))

    grid = (n_pad // tn, n_pad // tc)

    in_specs = [
        pl.BlockSpec((1, 1), lambda i, j: (0, 0),
                     memory_space=pltpu.SMEM),              # alpha scalar
        pl.BlockSpec((1, tc), lambda i, j: (0, j)),         # column norms
        pl.BlockSpec((tn, D), lambda i, j: (i, 0)),         # Z row tile
        pl.BlockSpec((tc, D), lambda i, j: (j, 0)),         # Z col tile
    ]
    args = [alpha_arr, nsq, Zp, Zp]
    if use_edges:
        # NOTE: pipeline_mode=pl.Buffered(3) on this spec is a possible v7x
        # micro-win after profiling; default double-buffering kept for safety.
        in_specs.append(pl.BlockSpec((tn, tc), lambda i, j: (i, j)))  # Y.beta plane
        args.append(yb)
        kernel = _decoder_kernel_edges
    else:
        kernel = _decoder_kernel_noedges

    out = pl.pallas_call(
        kernel,
        out_shape=jax.ShapeDtypeStruct((n_pad, n_pad), out_dtype),
        grid_spec=pltpu.PrefetchScalarGridSpec(
            num_scalar_prefetch=0,
            grid=grid,
            in_specs=in_specs,
            out_specs=pl.BlockSpec((tn, tc), lambda i, j: (i, j)),
        ),
        compiler_params=pltpu.CompilerParams(
            dimension_semantics=("parallel", "parallel"),
            vmem_limit_bytes=vmem_limit,
        ),
    )(*args)

    if n_pad != N:
        out = out[:N, :N]
    return out


def decoder_reference(Z, Y=None, alpha=0.0, beta=None, use_edges=True):
    g = Z @ Z.T
    tnp_ = jnp.sum(Z ** 2, axis=1).reshape(-1, 1)
    logits = -(tnp_ - 2.0 * g + tnp_.T) + alpha
    if use_edges:
        logits = logits + Y @ beta
    return jax.nn.sigmoid(logits)


if __name__ == "__main__":
    key = jax.random.PRNGKey(0)
    k1, k2, k3 = jax.random.split(key, 3)

    N, D, P = 16, 8, 4          # nodes, latent dim, edge-covariate dim
    Z = jax.random.normal(k1, (N, D), dtype=jnp.float32)
    Y = jax.random.normal(k2, (N, N, P), dtype=jnp.float32)
    beta = jax.random.normal(k3, (P,), dtype=jnp.float32)
    alpha = jnp.float32(0.5)

    ref = decoder_reference(Z, Y, alpha, beta)

    # Exact-precision covariate plane (f32): tight tolerance.
    out = jax.block_until_ready(
        decoder_forward(Z, Y, alpha, beta, yb_dtype=jnp.float32))
    assert out.shape == (N, N) and out.dtype == jnp.float32
    assert jnp.allclose(out, ref, atol=1e-5, rtol=1e-5), "f32 mismatch vs reference"

    # Default perf path (bf16 Y@beta plane): sigmoid output is bounded, so a
    # loose absolute tolerance covers the bf16 quantization of the logits.
    out_bf = jax.block_until_ready(decoder_forward(Z, Y, alpha, beta))
    assert jnp.allclose(out_bf, ref, atol=2e-2), "bf16 covariate plane mismatch"

    # use_edges == False branch.
    ref_ne = decoder_reference(Z, alpha=alpha, use_edges=False)
    out_ne = jax.block_until_ready(decoder_forward(Z, alpha=alpha, use_edges=False))
    assert jnp.allclose(out_ne, ref_ne, atol=1e-5, rtol=1e-5), "no-edges mismatch"

    # Exercise the multi-step 2-D grid / index maps on the padded array.
    out_t = jax.block_until_ready(
        decoder_forward(Z, Y, alpha, beta, yb_dtype=jnp.float32,
                        tile_n=8, tile_c=128))
    assert jnp.allclose(out_t, ref, atol=1e-5, rtol=1e-5), "tiled mismatch"

    print("KERNEL_OK")
</pallas_src>

<mosaic_0001>
module attributes {stable_mosaic.version = 11 : i64} {
  func.func @_decoder_kernel_edges(%arg0: i32, %arg1: i32, %arg2: memref<1x1xf32, #tpu.memory_space<smem>>, %arg3: memref<1x128xf32, #tpu.memory_space<vmem>>, %arg4: memref<128x8xf32, #tpu.memory_space<vmem>>, %arg5: memref<128x8xf32, #tpu.memory_space<vmem>>, %arg6: memref<128x128xf32, #tpu.memory_space<vmem>>, %arg7: memref<128x128xf32, #tpu.memory_space<vmem>>) attributes {dimension_semantics = [#tpu.dimension_semantics<parallel>, #tpu.dimension_semantics<parallel>], iteration_bounds = array<i64: 1, 1>, scalar_prefetch = 0 : i64, scratch_operands = 0 : i64, tpu.core_type = #tpu.core_type<tc>, window_params = [{transform_indices = @transform_0, window_bounds = array<i64: 1, 1>}, {transform_indices = @transform_1, window_bounds = array<i64: 1, 128>}, {transform_indices = @transform_2, window_bounds = array<i64: 128, 8>}, {transform_indices = @transform_3, window_bounds = array<i64: 128, 8>}, {transform_indices = @transform_4, window_bounds = array<i64: 128, 128>}, {transform_indices = @transform_5, window_bounds = array<i64: 128, 128>}]} {
    %c0 = arith.constant 0 : index
    %c0_0 = arith.constant 0 : index
    %0 = vector.load %arg4[%c0, %c0_0] : memref<128x8xf32, #tpu.memory_space<vmem>>, vector<128x8xf32>
    %c0_1 = arith.constant 0 : index
    %c0_2 = arith.constant 0 : index
    %1 = vector.load %arg5[%c0_1, %c0_2] : memref<128x8xf32, #tpu.memory_space<vmem>>, vector<128x8xf32>
    %c0_3 = arith.constant 0 : index
    %c0_4 = arith.constant 0 : index
    %2 = vector.load %arg3[%c0_3, %c0_4] : memref<1x128xf32, #tpu.memory_space<vmem>>, vector<1x128xf32>
    %c0_5 = arith.constant 0 : index
    %c0_6 = arith.constant 0 : index
    %3 = memref.load %arg2[%c0_5, %c0_6] : memref<1x1xf32, #tpu.memory_space<smem>>
    %cst = arith.constant dense<0.000000e+00> : vector<128x128xf32>
    %4 = tpu.matmul %0, %1, %cst {dimension_numbers = #tpu.dot_dimension_numbers<[1], [1], [0], [0], [0, 0, 1, 0], [], []>} : vector<128x8xf32>, vector<128x8xf32>, vector<128x128xf32> -> vector<128x128xf32>
    %5 = arith.mulf %0, %0 : vector<128x8xf32>
    %cst_7 = arith.constant dense<0.000000e+00> : vector<128xf32>
    %6 = vector.multi_reduction <add>, %5, %cst_7 [1] : vector<128x8xf32> to vector<128xf32>
    %7 = vector.shape_cast %6 : vector<128xf32> to vector<128x1xf32>
    %cst_8 = arith.constant 2.000000e+00 : f32
    %8 = vector.broadcast %cst_8 : f32 to vector<128x128xf32>
    %9 = arith.mulf %8, %4 : vector<128x128xf32>
    %10 = vector.broadcast %7 : vector<128x1xf32> to vector<128x128xf32>
    %11 = arith.subf %9, %10 : vector<128x128xf32>
    %12 = vector.broadcast %2 : vector<1x128xf32> to vector<128x128xf32>
    %13 = arith.subf %11, %12 : vector<128x128xf32>
    %14 = vector.broadcast %3 : f32 to vector<128x128xf32>
    %15 = arith.addf %13, %14 : vector<128x128xf32>
    %c0_9 = arith.constant 0 : index
    %c0_10 = arith.constant 0 : index
    %16 = vector.load %arg6[%c0_9, %c0_10] : memref<128x128xf32, #tpu.memory_space<vmem>>, vector<128x128xf32>
    %17 = arith.addf %15, %16 : vector<128x128xf32>
    %18 = arith.negf %17 : vector<128x128xf32>
    %19 = math.exp %18 : vector<128x128xf32>
    %cst_11 = arith.constant 1.000000e+00 : f32
    %20 = vector.broadcast %cst_11 : f32 to vector<128x128xf32>
    %21 = arith.addf %20, %19 : vector<128x128xf32>
    %22 = arith.divf %20, %21 : vector<128x128xf32>
    %c0_12 = arith.constant 0 : index
    %c0_13 = arith.constant 0 : index
    %23 = vector.load %arg7[%c0_12, %c0_13] : memref<128x128xf32, #tpu.memory_space<vmem>>, vector<128x128xf32>
    tpu.vector_store %arg7[%c0_12, %c0_13], %22 {strides = array<i32>} : memref<128x128xf32, #tpu.memory_space<vmem>>, vector<128x128xf32>,
    return
  }
  func.func @transform_0(%arg0: i32, %arg1: i32) -> (i32, i32) {
    %c0_i32 = arith.constant 0 : i32
    %c0_i32_0 = arith.constant 0 : i32
    %c0_i32_1 = arith.constant 0 : i32
    return %c0_i32, %c0_i32_0 : i32, i32
  }
  func.func @transform_1(%arg0: i32, %arg1: i32) -> (i32, i32) {
    %c0_i32 = arith.constant 0 : i32
    %c0_i32_0 = arith.constant 0 : i32
    return %c0_i32, %arg1 : i32, i32
  }
  func.func @transform_2(%arg0: i32, %arg1: i32) -> (i32, i32) {
    %c0_i32 = arith.constant 0 : i32
    %c0_i32_0 = arith.constant 0 : i32
    return %arg0, %c0_i32 : i32, i32
  }
  func.func @transform_3(%arg0: i32, %arg1: i32) -> (i32, i32) {
    %c0_i32 = arith.constant 0 : i32
    %c0_i32_0 = arith.constant 0 : i32
    return %arg1, %c0_i32 : i32, i32
  }
  func.func @transform_4(%arg0: i32, %arg1: i32) -> (i32, i32) {
    %c0_i32 = arith.constant 0 : i32
    return %arg0, %arg1 : i32, i32
  }
  func.func @transform_5(%arg0: i32, %arg1: i32) -> (i32, i32) {
    %c0_i32 = arith.constant 0 : i32
    return %arg0, %arg1 : i32, i32
  }
}

</mosaic_0001>

<bundles_post_ra>
// kernel: tpu_custom_call.1
= control target key start
LH: loop header
LB: loop body
LE: loop exit
PB: predicated region body
PF: predicated region fallthrough
CT: control target
= control target key end

     0   :  { %vm56_vm0 = vcmask 64512   ;;  %s1270_s0 = inlined_call_operand.<no memory space> [shape: f32[1,1], index: 0, kind: input, shape index: {}]   ;;  %s1271_s1 = inlined_call_operand.vmem [shape: f32[1,128], index: 1, kind: input, shape index: {}]   ;;  %s1272_s2 = inlined_call_operand.vmem [shape: f32[128,8], index: 2, kind: input, shape index: {}]   ;;  %s1273_s3 = inlined_call_operand.vmem [shape: f32[128,8], index: 3, kind: input, shape index: {}]   ;;  %s1274_s4 = inlined_call_operand.vmem [shape: f32[128,128], index: 4, kind: input, shape index: {}]   ;;  %s1275_s5 = inlined_call_operand.hbm [shape: f32[128,128], index: 5, kind: output, shape index: {}]  }
   0x1   :  { %v38_v0 = vld [vmem:[%s1273_s3] sm:$0xff]  ;;  %v39_v1 = vld [vmem:[%s1273_s3 + $0x8] sm:$0xff]  ;;  %v40_v2 = vld [vmem:[%s1273_s3 + $0x10] sm:$0xff] }
   0x2   :  { %v730_v3 = vpack.c.bf16 %v39_v1, %v38_v0  ;;  %vm929_vm1 = vmpackc.low %vm56_vm0, %vm56_vm0  ;;  %v41_v5 = vld [vmem:[%s1273_s3 + $0x18] sm:$0xff]  ;;  %v42_v7 = vld [vmem:[%s1273_s3 + $0x20] sm:$0xff] }
   0x3   :  { %v736_v6 = vpack.c.bf16 %v41_v5, %v40_v2  ;;  %v22_v8 = vld [vmem:[%s1272_s2] sm:$0xff]  ;;  %v43_v9 = vld [vmem:[%s1273_s3 + $0x28] sm:$0xff]  ;;  %v970_v13 = vld [vmem:[%s1272_s2 + $0x10] sm:$0xff] }
   0x4   :  { %732 = vmatprep.subr.msk.bf16.mxu0 %vm929_vm1, %v730_v3  ;;  %778 = vmatprep.subr.msk.bf16.mxu1 %vm929_vm1, %v730_v3  ;;  %v298_v10 = vmul.f32 %v22_v8, %v22_v8  ;;  %v30_v11 = vld [vmem:[%s1272_s2 + $0x40] sm:$0xff]  ;;  %v964_v12 = vld [vmem:[%s1272_s2 + $0x8] sm:$0xff]  ;;  %v975_v14 = vld [vmem:[%s1272_s2 + $0x18] sm:$0xff]  ;;  %v300_v16 = vmul.f32 %v970_v13, %v970_v13  ;;  %v742_v19 = vpack.c.bf16 %v43_v9, %v42_v7 }
   0x5   :  { %735 = vmatpush3.bf16.xpose.msk.msra.mxu0 %vm929_vm1, %v730_v3  ;;  %786 = vmatpush3.bf16.xpose.msk.msra.mxu1 %vm929_vm1, %v730_v3  ;;  %v299_v15 = vmul.f32 %v964_v12, %v964_v12  ;;  %v301_v18 = vmul.f32 %v975_v14, %v975_v14  ;;  %v987_v20 = vld [vmem:[%s1272_s2 + $0x20] sm:$0xff]  ;;  %v993_v22 = vld [vmem:[%s1272_s2 + $0x28] sm:$0xff] }
   0x6   :  { %738 = vmatprep.subr.msk.bf16.mxu0 %vm929_vm1, %v736_v6  ;;  %779 = vmatprep.subr.msk.bf16.mxu1 %vm929_vm1, %v736_v6  ;;  %v314_v17 = vsel %vm56_vm0, %v298_v10, 0.0  ;;  %v320_v21 = vsel %vm56_vm0, %v300_v16, 0.0  ;;  %v302_v24 = vmul.f32 %v987_v20, %v987_v20 }
   0x7   :  { %706 = vmatprep.mubr.msk.f32.mxu0 %vm56_vm0, %v22_v8  ;;  %718 = vmatprep.mubr.msk.f32.mxu1 %vm56_vm0, %v30_v11  ;;  %v317_v23 = vsel %vm56_vm0, %v299_v15, 0.0 }
   0x8   :  { %315 = vadd.xlane.f32.xlu0 %v314_v17  ;;  %321 = vadd.xlane.f32.xlu1 %v320_v21 }
   0x9   :  { %11 = vsyncpa [#allocation4], 0  ;;  %v323_v25 = vsel %vm56_vm0, %v301_v18, 0.0  ;;  %v303_v26 = vmul.f32 %v993_v22, %v993_v22  ;;  %v44_v27 = vld [vmem:[%s1273_s3 + $0x30] sm:$0xff]  ;;  %v45_v28 = vld [vmem:[%s1273_s3 + $0x38] sm:$0xff]  ;;  %v326_v31 = vsel %vm56_vm0, %v302_v24, 0.0  ;;  %v306_v36 = vmul.f32 %v30_v11, %v30_v11 }
   0xa   :  { %v1018_v29 = vld [vmem:[%s1272_s2 + $0x30] sm:$0xff]  ;;  %v1023_v30 = vld [vmem:[%s1272_s2 + $0x38] sm:$0xff]  ;;  %v748_v35 = vpack.c.bf16 %v45_v28, %v44_v27  ;;  %v1034_v37 = vld [vmem:[%s1272_s2 + $0x48] sm:$0xff] }
   0xb   :  { %v304_v32 = vmul.f32 %v1018_v29, %v1018_v29  ;;  %v329_v33 = vsel %vm56_vm0, %v303_v26, 0.0  ;;  %v305_v34 = vmul.f32 %v1023_v30, %v1023_v30  ;;  %v307_v40 = vmul.f32 %v1034_v37, %v1034_v37  ;;  %v46_v41 = vld [vmem:[%s1273_s3 + $0x40] sm:$0xff]  ;;  %v47_v42 = vld [vmem:[%s1273_s3 + $0x48] sm:$0xff]  ;;  %v32_v43 = vld [vmem:[%s1272_s2 + $0x50] sm:$0xff] }
   0xc   :  { %318 = vadd.xlane.f32.xlu0 %v317_v23  ;;  %324 = vadd.xlane.f32.xlu1 %v323_v25  ;;  %v33_v44 = vld [vmem:[%s1272_s2 + $0x58] sm:$0xff]  ;;  %v338_v45 = vsel %vm56_vm0, %v306_v36, 0.0  ;;  %v308_v46 = vmul.f32 %v32_v43, %v32_v43  ;;  %v754_v49 = vpack.c.bf16 %v47_v42, %v46_v41  ;;  %v34_v50 = vld [vmem:[%s1272_s2 + $0x60] sm:$0xff]  ;;  %v35_v51 = vld [vmem:[%s1272_s2 + $0x68] sm:$0xff] }
   0xd   :  { %741 = vmatpush3.bf16.xpose.msk.msra.mxu0 %vm929_vm1, %v736_v6  ;;  %787 = vmatpush3.bf16.xpose.msk.msra.mxu1 %vm929_vm1, %v736_v6  ;;  %v332_v38 = vsel %vm56_vm0, %v304_v32, 0.0  ;;  %v335_v39 = vsel %vm56_vm0, %v305_v34, 0.0  ;;  %v341_v47 = vsel %vm56_vm0, %v307_v40, 0.0  ;;  %v309_v48 = vmul.f32 %v33_v44, %v33_v44  ;;  %v48_v56 = vld [vmem:[%s1273_s3 + $0x50] sm:$0xff]  ;;  %v49_v57 = vld [vmem:[%s1273_s3 + $0x58] sm:$0xff]  ;;  %v50_v3 = vld [vmem:[%s1273_s3 + $0x60] sm:$0xff] }
   0xe   :  { %744 = vmatprep.subr.msk.bf16.mxu0 %vm929_vm1, %v742_v19  ;;  %780 = vmatprep.subr.msk.bf16.mxu1 %vm929_vm1, %v742_v19  ;;  %v344_v52 = vsel %vm56_vm0, %v308_v46, 0.0  ;;  %v310_v53 = vmul.f32 %v34_v50, %v34_v50  ;;  %v311_v55 = vmul.f32 %v35_v51, %v35_v51  ;;  %v36_v58 = vld [vmem:[%s1272_s2 + $0x70] sm:$0xff]  ;;  %v37_v59 = vld [vmem:[%s1272_s2 + $0x78] sm:$0xff]  ;;  %v760_v0 = vpack.c.bf16 %v49_v57, %v48_v56  ;;  %v51_v5 = vld [vmem:[%s1273_s3 + $0x68] sm:$0xff] }
   0xf   :  { %v347_v54 = vsel %vm56_vm0, %v309_v48, 0.0  ;;  %v312_v61 = vmul.f32 %v36_v58, %v36_v58  ;;  %v313_v63 = vmul.f32 %v37_v59, %v37_v59  ;;  %v766_v6 = vpack.c.bf16 %v51_v5, %v50_v3  ;;  %v52_v7 = vld [vmem:[%s1273_s3 + $0x70] sm:$0xff]  ;;  %v53_v8 = vld [vmem:[%s1273_s3 + $0x78] sm:$0xff]  ;;  %v1167_v25 = vld [vmem:[%s1271_s1] ss:$0 sm:$0xff] }
  0x10   :  { %327 = vadd.xlane.f32.xlu0 %v326_v31  ;;  %330 = vadd.xlane.f32.xlu1 %v329_v33  ;;  %v350_v60 = vsel %vm56_vm0, %v310_v53, 0.0  ;;  %v353_v62 = vsel %vm56_vm0, %v311_v55, 0.0  ;;  %v772_v9 = vpack.c.bf16 %v53_v8, %v52_v7  ;;  %v1172_v32 = vstv %s1270_s0  ;;  %v444_v8 = vld [vmem:[%s1274_s4 + $0x58] sm:$0xff] }
  0x11   :  { %v356_v1 = vsel %vm56_vm0, %v312_v61, 0.0  ;;  %v359_v2 = vsel %vm56_vm0, %v313_v63, 0.0 }
  0x14   :  { %333 = vadd.xlane.f32.xlu0 %v332_v38  ;;  %336 = vadd.xlane.f32.xlu1 %v335_v39 }
  0x15   :  { %747 = vmatpush3.bf16.xpose.msk.msra.mxu0 %vm929_vm1, %v742_v19  ;;  %788 = vmatpush3.bf16.xpose.msk.msra.mxu1 %vm929_vm1, %v742_v19 }
  0x16   :  { %750 = vmatprep.subr.msk.bf16.mxu0 %vm929_vm1, %v748_v35  ;;  %781 = vmatprep.subr.msk.bf16.mxu1 %vm929_vm1, %v748_v35 }
  0x18   :  { %339 = vadd.xlane.f32.xlu0 %v338_v45  ;;  %342 = vadd.xlane.f32.xlu1 %v341_v47  ;;  %v442_v45 = vld [vmem:[%s1274_s4 + $0x48] sm:$0xff] }
  0x1c   :  { %345 = vadd.xlane.f32.xlu0 %v344_v52  ;;  %348 = vadd.xlane.f32.xlu1 %v347_v54  ;;  %v441_v52 = vld [vmem:[%s1274_s4 + $0x40] sm:$0xff] }
  0x1d   :  { %753 = vmatpush3.bf16.xpose.msk.msra.mxu0 %vm929_vm1, %v748_v35  ;;  %789 = vmatpush3.bf16.xpose.msk.msra.mxu1 %vm929_vm1, %v748_v35 }
  0x1e   :  { %756 = vmatprep.subr.msk.bf16.mxu0 %vm929_vm1, %v754_v49  ;;  %782 = vmatprep.subr.msk.bf16.mxu1 %vm929_vm1, %v754_v49 }
  0x20   :  { %351 = vadd.xlane.f32.xlu0 %v350_v60  ;;  %354 = vadd.xlane.f32.xlu1 %v353_v62 }
  0x24   :  { %357 = vadd.xlane.f32.xlu0 %v356_v1  ;;  %360 = vadd.xlane.f32.xlu1 %v359_v2 }
  0x25   :  { %759 = vmatpush3.bf16.xpose.msk.msra.mxu0 %vm929_vm1, %v754_v49  ;;  %790 = vmatpush3.bf16.xpose.msk.msra.mxu1 %vm929_vm1, %v754_v49 }
  0x26   :  { %762 = vmatprep.subr.msk.bf16.mxu0 %vm929_vm1, %v760_v0  ;;  %783 = vmatprep.subr.msk.bf16.mxu1 %vm929_vm1, %v760_v0 }
  0x2d   :  { %765 = vmatpush3.bf16.xpose.msk.msra.mxu0 %vm929_vm1, %v760_v0  ;;  %791 = vmatpush3.bf16.xpose.msk.msra.mxu1 %vm929_vm1, %v760_v0 }
  0x2e   :  { %768 = vmatprep.subr.msk.bf16.mxu0 %vm929_vm1, %v766_v6  ;;  %784 = vmatprep.subr.msk.bf16.mxu1 %vm929_vm1, %v766_v6 }
  0x35   :  { %771 = vmatpush3.bf16.xpose.msk.msra.mxu0 %vm929_vm1, %v766_v6  ;;  %792 = vmatpush3.bf16.xpose.msk.msra.mxu1 %vm929_vm1, %v766_v6  ;;  %v436_v6 = vld [vmem:[%s1274_s4 + $0x18] sm:$0xff] }
  0x36   :  { %774 = vmatprep.subr.msk.bf16.mxu0 %vm929_vm1, %v772_v9  ;;  %785 = vmatprep.subr.msk.bf16.mxu1 %vm929_vm1, %v772_v9 }
  0x3d   :  { %777 = vmatpush3.bf16.xpose.msk.msra.mxu0 %vm929_vm1, %v772_v9  ;;  %793 = vmatpush3.bf16.xpose.msk.msra.mxu1 %vm929_vm1, %v772_v9 }
  0x44   :  { %707 = vmatmul.mubr.msk.f32.vlgmr.msra.gmra.mrb[0].mxu0 %vm56_vm0, %v964_v12  ;;  %719 = vmatmul.mubr.msk.f32.vlgmr.msra.gmra.mrb[0].mxu1 %vm56_vm0, %v1034_v37 }
  0x45   :  { %709 = vmatprep.mubr.msk.f32.mxu0 %vm56_vm0, %v970_v13  ;;  %721 = vmatprep.mubr.msk.f32.mxu1 %vm56_vm0, %v32_v43  ;;  %v434_v43 = vld [vmem:[%s1274_s4 + $0x8] sm:$0xff] }
  0x48   :  { %710 = vmatmul.mubr.msk.f32.gmra.mrb[2].mxu0 %vm56_vm0, %v975_v14  ;;  %722 = vmatmul.mubr.msk.f32.gmra.mrb[2].mxu1 %vm56_vm0, %v33_v44 }
  0x49   :  { %712 = vmatprep.mubr.msk.f32.mxu0 %vm56_vm0, %v987_v20  ;;  %724 = vmatprep.mubr.msk.f32.mxu1 %vm56_vm0, %v34_v50  ;;  %v433_v50 = vld [vmem:[%s1274_s4] sm:$0xff] }
  0x4c   :  { %713 = vmatmul.mubr.msk.f32.gmra.mrb[4].mxu0 %vm56_vm0, %v993_v22  ;;  %725 = vmatmul.mubr.msk.f32.gmra.mrb[4].mxu1 %vm56_vm0, %v35_v51 }
  0x4d   :  { %715 = vmatprep.mubr.msk.f32.mxu0 %vm56_vm0, %v1018_v29  ;;  %727 = vmatprep.mubr.msk.f32.mxu1 %vm56_vm0, %v36_v58 }
  0x50   :  { %716 = vmatmul.mubr.msk.f32.gmra.mrb[6].mxu0 %vm56_vm0, %v1023_v30  ;;  %728 = vmatmul.mubr.msk.f32.gmra.mrb[6].mxu1 %vm56_vm0, %v37_v59 }
  0x95   :  { %v322_v4 = vpop.xlane.xlu1 %321  ;;  %v316_v10 = vpop.xlane.xlu0 %315 }
  0x99   :  { %v325_v11 = vpop.xlane.xlu1 %324  ;;  %v319_v12 = vpop.xlane.xlu0 %318 }
  0x9d   :  { %v1156_v13 = vpop.xlane.xlu1 %330  ;;  %v1158_v14 = vpop.xlane.xlu0 %327 }
  0xa1   :  { %v1160_v15 = vpop.xlane.xlu1 %336  ;;  %v1162_v16 = vpop.xlane.xlu0 %333 }
  0xa5   :  { %v343_v17 = vpop.xlane.xlu1 %342  ;;  %v340_v18 = vpop.xlane.xlu0 %339 }
  0xa9   :  { %v349_v30 = vpop.xlane.xlu1 %348  ;;  %v346_v31 = vpop.xlane.xlu0 %345 }
 0x117   :  { %v708_v19 = vpop.f32.mrb[0].mxu0  ;;  %v720_v20 = vpop.f32.mrb[0].mxu1 }
 0x118   :  { %v363_v21 = vmul.f32 2.0, %v708_v19  ;;  %v371_v22 = vmul.f32 2.0, %v720_v20  ;;  %v219_v23 = vpop.f32.mrb[1].mxu0  ;;  %v259_v24 = vpop.f32.mrb[1].mxu1 }
 0x119   :  { %v362_v26 = vmul.f32 2.0, %v219_v23  ;;  %v370_v27 = vmul.f32 2.0, %v259_v24 }
 0x11a   :  { %v379_v28 = vsub.f32 %v363_v21, %v319_v12  ;;  %v387_v29 = vsub.f32 %v371_v22, %v343_v17  ;;  %v435_v12 = vld [vmem:[%s1274_s4 + $0x10] sm:$0xff] }
 0x11b   :  { %v378_v33 = vsub.f32 %v362_v26, %v316_v10  ;;  %v386_v34 = vsub.f32 %v370_v27, %v340_v18  ;;  %v711_v35 = vpop.f32.mrb[2].mxu0  ;;  %v723_v36 = vpop.f32.mrb[2].mxu1  ;;  %v443_v18 = vld [vmem:[%s1274_s4 + $0x50] sm:$0xff] }
 0x11c   :  { %v401_v37 = vsub.f32 %v379_v28, %v1167_v25  ;;  %v409_v38 = vsub.f32 %v387_v29, %v1167_v25  ;;  %v365_v39 = vmul.f32 2.0, %v711_v35  ;;  %v373_v40 = vmul.f32 2.0, %v723_v36  ;;  %v229_v41 = vpop.f32.mrb[3].mxu0  ;;  %v269_v42 = vpop.f32.mrb[3].mxu1 }
 0x11d   :  { %v400_v44 = vsub.f32 %v378_v33, %v1167_v25  ;;  %v408_v46 = vsub.f32 %v386_v34, %v1167_v25  ;;  %v364_v47 = vmul.f32 2.0, %v229_v41  ;;  %v372_v48 = vmul.f32 2.0, %v269_v42  ;;  %v355_v35 = vpop.xlane.xlu1 %354  ;;  %v352_v42 = vpop.xlane.xlu0 %351 }
 0x11e   :  { %v418_v49 = vadd.f32 %v1172_v32, %v401_v37  ;;  %v426_v51 = vadd.f32 %v1172_v32, %v409_v38  ;;  %v381_v53 = vsub.f32 %v365_v39, %v325_v11  ;;  %v389_v54 = vsub.f32 %v373_v40, %v349_v30 }
 0x11f   :  { %v417_v55 = vadd.f32 %v1172_v32, %v400_v44  ;;  %v425_v56 = vadd.f32 %v1172_v32, %v408_v46  ;;  %v380_v57 = vsub.f32 %v364_v47, %v322_v4  ;;  %v388_v58 = vsub.f32 %v372_v48, %v346_v31  ;;  %v714_v59 = vpop.f32.mrb[4].mxu0  ;;  %v726_v60 = vpop.f32.mrb[4].mxu1  ;;  %v438_v46 = vld [vmem:[%s1274_s4 + $0x28] sm:$0xff] }
 0x120   :  { %v450_v61 = vadd.f32 %v434_v43, %v418_v49  ;;  %v458_v62 = vadd.f32 %v442_v45, %v426_v51  ;;  %v403_v63 = vsub.f32 %v381_v53, %v1167_v25  ;;  %v411_v0 = vsub.f32 %v389_v54, %v1167_v25  ;;  %v239_v1 = vpop.f32.mrb[5].mxu0  ;;  %v279_v2 = vpop.f32.mrb[5].mxu1  ;;  %v446_v53 = vld [vmem:[%s1274_s4 + $0x68] sm:$0xff] }
 0x121   :  { %v449_v3 = vadd.f32 %v433_v50, %v417_v55  ;;  %v457_v5 = vadd.f32 %v441_v52, %v425_v56  ;;  %v402_v7 = vsub.f32 %v380_v57, %v1167_v25  ;;  %v410_v9 = vsub.f32 %v388_v58, %v1167_v25 }
 0x122   :  { %v627_v4 = vmul.f32 -1.442695, %v450_v61  ;;  %v635_v10 = vmul.f32 -1.442695, %v458_v62  ;;  %v420_v11 = vadd.f32 %v1172_v32, %v403_v63  ;;  %v428_v17 = vadd.f32 %v1172_v32, %v411_v0  ;;  %v358_v63 = vpop.xlane.xlu0 %357 }
 0x123   :  { %v626_v19 = vmul.f32 -1.442695, %v449_v3  ;;  %v634_v20 = vmul.f32 -1.442695, %v457_v5  ;;  %v419_v21 = vadd.f32 %v1172_v32, %v402_v7  ;;  %v427_v22 = vadd.f32 %v1172_v32, %v410_v9  ;;  %v717_v23 = vpop.f32.mrb[6].mxu0  ;;  %v729_v24 = vpop.f32.mrb[6].mxu1 }
 0x124   :  { %797 = vpow2.f32 %v627_v4  ;;  %v452_v26 = vadd.f32 %v436_v6, %v420_v11  ;;  %v460_v27 = vadd.f32 %v444_v8, %v428_v17  ;;  %v367_v28 = vmul.f32 2.0, %v714_v59  ;;  %v249_v29 = vpop.f32.mrb[7].mxu0  ;;  %v289_v30 = vpop.f32.mrb[7].mxu1 }
 0x125   :  { %799 = vpow2.f32 %v626_v19  ;;  %v451_v31 = vadd.f32 %v435_v12, %v419_v21  ;;  %v459_v33 = vadd.f32 %v443_v18, %v427_v22  ;;  %v375_v34 = vmul.f32 2.0, %v726_v60  ;;  %v361_v59 = vpop.xlane.xlu1 %360  ;;  %v440_v19 = vld [vmem:[%s1274_s4 + $0x38] sm:$0xff] }
 0x126   :  { %801 = vpow2.f32 %v635_v10  ;;  %v629_v36 = vmul.f32 -1.442695, %v452_v26  ;;  %v637_v37 = vmul.f32 -1.442695, %v460_v27  ;;  %v383_v38 = vsub.f32 %v367_v28, %v1156_v13  ;;  %v439_v28 = vld [vmem:[%s1274_s4 + $0x30] sm:$0xff] }
 0x127   :  { %803 = vpow2.f32 %v634_v20  ;;  %v628_v39 = vmul.f32 -1.442695, %v451_v31  ;;  %v636_v40 = vmul.f32 -1.442695, %v459_v33  ;;  %v366_v41 = vmul.f32 2.0, %v239_v1 }
 0x128   :  { %805 = vpow2.f32 %v629_v36  ;;  %v405_v43 = vsub.f32 %v383_v38, %v1167_v25  ;;  %v374_v44 = vmul.f32 2.0, %v279_v2  ;;  %v391_v45 = vsub.f32 %v375_v34, %v355_v35  ;;  %v448_v34 = vld [vmem:[%s1274_s4 + $0x78] sm:$0xff] }
 0x129   :  { %807 = vpow2.f32 %v628_v39  ;;  %v382_v47 = vsub.f32 %v366_v41, %v1158_v14  ;;  %v369_v48 = vmul.f32 2.0, %v717_v23  ;;  %v377_v49 = vmul.f32 2.0, %v729_v24 }
 0x12a   :  { %809 = vpow2.f32 %v637_v37  ;;  %v422_v13 = vadd.f32 %v1172_v32, %v405_v43  ;;  %v413_v50 = vsub.f32 %v391_v45, %v1167_v25  ;;  %v390_v51 = vsub.f32 %v374_v44, %v352_v42 }
 0x12b   :  { %811 = vpow2.f32 %v636_v40  ;;  %v404_v52 = vsub.f32 %v382_v47, %v1167_v25  ;;  %v385_v54 = vsub.f32 %v369_v48, %v1160_v15  ;;  %v368_v55 = vmul.f32 2.0, %v249_v29  ;;  %v437_v15 = vld [vmem:[%s1274_s4 + $0x20] sm:$0xff]  ;;  %v447_v40 = vld [vmem:[%s1274_s4 + $0x70] sm:$0xff] }
 0x12c   :  { %v454_v56 = vadd.f32 %v438_v46, %v422_v13  ;;  %v430_v14 = vadd.f32 %v1172_v32, %v413_v50  ;;  %v412_v57 = vsub.f32 %v390_v51, %v1167_v25  ;;  %v376_v58 = vmul.f32 2.0, %v289_v30 }
 0x12d   :  { %v421_v60 = vadd.f32 %v1172_v32, %v404_v52  ;;  %v407_v61 = vsub.f32 %v385_v54, %v1167_v25  ;;  %v384_v62 = vsub.f32 %v368_v55, %v1162_v16  ;;  %v393_v8 = vsub.f32 %v377_v49, %v361_v59  ;;  %v445_v16 = vld [vmem:[%s1274_s4 + $0x60] sm:$0xff]  ;;  %s885_s4 = smov [#allocation3]  }
 0x12e   :  { %v798_v0 = vpop.eup %797  ;;  %v631_v1 = vmul.f32 -1.442695, %v454_v56  ;;  %v462_v2 = vadd.f32 %v446_v53, %v430_v14  ;;  %v429_v6 = vadd.f32 %v1172_v32, %v412_v57  ;;  %v392_v11 = vsub.f32 %v376_v58, %v358_v63  ;;  %s582_s10 = sshll.u32 %s885_s4, 4  ;;  %s583_s10 = int_to_ptr.vmem [resolvable:$true] %s582_s10 }
 0x12f   :  { %v800_v3 = vpop.eup %799  ;;  %v514_v5 = vadd.f32 1.0, %v798_v0  ;;  %v406_v7 = vsub.f32 %v384_v62, %v1167_v25  ;;  %v424_v10 = vadd.f32 %v1172_v32, %v407_v61  ;;  %v453_v18 = vadd.f32 %v437_v15, %v421_v60  ;;  %s861_s11 = scalar_lea.vmem %s583_s10, 2048  ;;  %p866_p1 = scmp.lt.s32.totalorder %s583_s10, %s583_s10 }
 0x130   :  { %v802_v9 = vpop.eup %801  ;;  %v513_v4 = vadd.f32 1.0, %v800_v3  ;;  %813 = vpow2.f32 %v631_v1  ;;  %v639_v22 = vmul.f32 -1.442695, %v462_v2  ;;  %v461_v27 = vadd.f32 %v445_v16, %v429_v6  ;;  %p862_p0 = scmp.ne.s32.totalorder %s583_s10, %s861_s11  ;;  %p867_p2 = scmp.lt.s32.totalorder %s861_s11, %s861_s11 }
 0x131   :  { %v804_v12 = vpop.eup %803  ;;  %815 = vrcp.f32 %v514_v5  ;;  %v522_v17 = vadd.f32 1.0, %v802_v9  ;;  %v423_v23 = vadd.f32 %v1172_v32, %v406_v7  ;;  %v415_v29 = vsub.f32 %v393_v8, %v1167_v25 }
 0x132   :  { %v806_v20 = vpop.eup %805  ;;  %817 = vrcp.f32 %v513_v4  ;;  %v521_v21 = vadd.f32 1.0, %v804_v12  ;;  %v456_v33 = vadd.f32 %v440_v19, %v424_v10  ;;  %v414_v35 = vsub.f32 %v392_v11, %v1167_v25  ;;  %p868_p3 = por %p867_p2, %p866_p1 }
 0x133   :  { %v808_v24 = vpop.eup %807  ;;  %819 = vrcp.f32 %v522_v17  ;;  %v516_v26 = vadd.f32 1.0, %v806_v20  ;;  %v630_v38 = vmul.f32 -1.442695, %v453_v18  ;;  %v432_v39 = vadd.f32 %v1172_v32, %v415_v29 }
 0x134   :  { %v810_v30 = vpop.eup %809  ;;  %821 = vrcp.f32 %v521_v21  ;;  %v515_v31 = vadd.f32 1.0, %v808_v24  ;;  %v455_v42 = vadd.f32 %v439_v28, %v423_v23  ;;  %v431_v43 = vadd.f32 %v1172_v32, %v414_v35  ;;  %p869_p4 = pnand %p868_p3, %p862_p0 }
 0x135   :  { %v812_v36 = vpop.eup %811  ;;  %823 = vrcp.f32 %v516_v26  ;;  %v524_v37 = vadd.f32 1.0, %v810_v30  ;;  %v638_v44 = vmul.f32 -1.442695, %v461_v27  ;;  %v464_v45 = vadd.f32 %v448_v34, %v432_v39 }
 0x136   :  { %825 = vrcp.f32 %v515_v31  ;;  %v523_v41 = vadd.f32 1.0, %v812_v36  ;;  %v633_v25 = vmul.f32 -1.442695, %v456_v33  ;;  %v463_v46 = vadd.f32 %v447_v40, %v431_v43 }
 0x137   :  { %827 = vrcp.f32 %v524_v37  ;;  %v632_v48 = vmul.f32 -1.442695, %v455_v42  ;;  %v641_v50 = vmul.f32 -1.442695, %v464_v45 }
 0x138   :  { %829 = vrcp.f32 %v523_v41  ;;  %v640_v52 = vmul.f32 -1.442695, %v463_v46 }
 0x139   :  { %831 = vpow2.f32 %v630_v38 }
 0x13a   :  { %v814_v47 = vpop.eup %813  ;;  %833 = vpow2.f32 %v639_v22 }
 0x13b   :  { %v816_v49 = vpop.eup %815  ;;  %v518_v13 = vadd.f32 1.0, %v814_v47  ;;  %835 = vpow2.f32 %v638_v44 }
 0x13c   :  { %v818_v51 = vpop.eup %817  ;;  %562 = vst [vmem:[#allocation3 + $0x8] sm:$0xff] %v816_v49  ;;  %837 = vpow2.f32 %v633_v25 }
 0x13d   :  { %v820_v53 = vpop.eup %819  ;;  %561 = vst [vmem:[#allocation3] sm:$0xff] %v818_v51  ;;  %839 = vrcp.f32 %v518_v13 }
 0x13e   :  { %v822_v32 = vpop.eup %821  ;;  %570 = vst [vmem:[#allocation3 + $0x48] sm:$0xff] %v820_v53  ;;  %841 = vpow2.f32 %v632_v48 }
 0x13f   :  { %v824_v54 = vpop.eup %823  ;;  %569 = vst [vmem:[#allocation3 + $0x40] sm:$0xff] %v822_v32  ;;  %843 = vpow2.f32 %v641_v50 }
 0x140   :  { %v826_v55 = vpop.eup %825  ;;  %564 = vst [vmem:[#allocation3 + $0x18] sm:$0xff] %v824_v54  ;;  %845 = vpow2.f32 %v640_v52 }
 0x141   :  { %v828_v56 = vpop.eup %827  ;;  %563 = vst [vmem:[#allocation3 + $0x10] sm:$0xff] %v826_v55 }
 0x142   :  { %v830_v14 = vpop.eup %829  ;;  %572 = vst [vmem:[#allocation3 + $0x58] sm:$0xff] %v828_v56 }
 0x143   :  { %v832_v57 = vpop.eup %831  ;;  %571 = vst [vmem:[#allocation3 + $0x50] sm:$0xff] %v830_v14 }
 0x144   :  { %v834_v58 = vpop.eup %833  ;;  %v517_v59 = vadd.f32 1.0, %v832_v57 }
 0x145   :  { %v836_v60 = vpop.eup %835  ;;  %v526_v61 = vadd.f32 1.0, %v834_v58 }
 0x146   :  { %v838_v62 = vpop.eup %837  ;;  %847 = vrcp.f32 %v517_v59  ;;  %v525_v63 = vadd.f32 1.0, %v836_v60 }
 0x147   :  { %v840_v0 = vpop.eup %839  ;;  %849 = vrcp.f32 %v526_v61  ;;  %v520_v1 = vadd.f32 1.0, %v838_v62 }
 0x148   :  { %v842_v15 = vpop.eup %841  ;;  %566 = vst [vmem:[#allocation3 + $0x28] sm:$0xff] %v840_v0  ;;  %851 = vrcp.f32 %v525_v63 }
 0x149   :  { %v844_v2 = vpop.eup %843  ;;  %853 = vrcp.f32 %v520_v1  ;;  %v519_v3 = vadd.f32 1.0, %v842_v15 }
 0x14a   :  { %v846_v5 = vpop.eup %845  ;;  %v528_v6 = vadd.f32 1.0, %v844_v2 }
 0x14b   :  { %855 = vrcp.f32 %v519_v3  ;;  %v527_v7 = vadd.f32 1.0, %v846_v5 }
 0x14c   :  { %857 = vrcp.f32 %v528_v6 }
 0x14d   :  { %859 = vrcp.f32 %v527_v7 }
 0x150   :  { %v848_v8 = vpop.eup %847 }
 0x151   :  { %v850_v9 = vpop.eup %849  ;;  %565 = vst [vmem:[#allocation3 + $0x20] sm:$0xff] %v848_v8 }
 0x152   :  { %v852_v4 = vpop.eup %851  ;;  %574 = vst [vmem:[#allocation3 + $0x68] sm:$0xff] %v850_v9 }
 0x153   :  { %v854_v16 = vpop.eup %853  ;;  %573 = vst [vmem:[#allocation3 + $0x60] sm:$0xff] %v852_v4 }
 0x154   :  { %568 = vst [vmem:[#allocation3 + $0x38] sm:$0xff] %v854_v16 }
 0x155   :  { %v856_v10 = vpop.eup %855 }
 0x156   :  { %v858_v11 = vpop.eup %857  ;;  %567 = vst [vmem:[#allocation3 + $0x30] sm:$0xff] %v856_v10 }
 0x157   :  { %v860_v12 = vpop.eup %859  ;;  %576 = vst [vmem:[#allocation3 + $0x78] sm:$0xff] %v858_v11 }
 0x158   :  { %575 = vst [vmem:[#allocation3 + $0x70] sm:$0xff] %v860_v12 }
 0x159   :  { %872 = shalt.err (!%p869_p4)
}
 0x15a   :  { %s873_s14 = scalar_lea.hbm %s1275_s5, 2048 }
 0x15b   :  { %p874_p5 = scmp.ne.s32.totalorder %s1275_s5, %s873_s14  ;;  %p877_p6 = scmp.lt.u32.totalorder %s873_s14, %s1275_s5 }
 0x15d   :  { %p879_p7 = pnand %p877_p6, %p874_p5 }
 0x15f   :  { %882 = shalt.err (!%p879_p7)
}
 0x160   :  { %s886_s19 = smov 128   ;;  %s887_s20 = smov 8  }
 0x161   :  { %588 = dma.vmem_to_hbm [thread:$0]  %s583_s10, 2048, %s1275_s5, [#allocation4], %s886_s19, %s886_s19, %s887_s20  }
 0x162   :  { %883 = dma.done.wait [#allocation4], 2048  }
 0x163   :  { %884 = vsyncadd [#allocation4], 4294965248 }
 0x164   :  { %592 = vsyncpa [#allocation4], 1 }

</bundles_post_ra>
